<compile_context>
chip_gen: v5e
topology: v5e:2x2
jax: 0.10.0
libtpu: 0.0.40
codegen_flags: <defaults>
</compile_context>

<pallas_src>
import jax
import jax.numpy as jnp
from jax.experimental import pallas as pl
from jax.experimental.pallas import tpu as pltpu

LANE = 128      # lane width: pad feature dims to this
SUBLANE = 8     # sublane: batch tiles must be multiples of this


def _round_up(x, m):
    return (x + m - 1) // m * m


# ---------------------------------------------------------------------------
# Pallas kernel: fused MLP (all Linear layers + interleaved ReLU in one body)
# ---------------------------------------------------------------------------
def _make_mlp_kernel(num_layers, last_activation=False):
    """refs = (x_tile, w0, b0, w1, b1, ..., out_tile)."""

    def kernel(*refs):
        x_ref = refs[0]
        o_ref = refs[-1]
        wb = refs[1:-1]

        h = x_ref[...]                         # bf16 (TM, D_pad)
        for i in range(num_layers):
            w = wb[2 * i][...]                 # bf16 (in_pad, out_pad)
            b = wb[2 * i + 1][...]             # f32  (1, out_pad)
            acc = jnp.dot(h, w, preferred_element_type=jnp.float32) + b
            is_last = i == num_layers - 1
            if (not is_last) or last_activation:
                # TODO(synk): last_activation in the PyTorch module may be an
                # arbitrary activation via get_activation_function; ReLU only here.
                acc = jnp.maximum(acc, 0.0)    # ReLU in f32 (VPU)
            h = acc if is_last else acc.astype(jnp.bfloat16)
        o_ref[...] = h.astype(o_ref.dtype)

    return kernel


# ---------------------------------------------------------------------------
# One-time parameter prep: PyTorch (out,in) -> (in,out), pad to 128, cast bf16
# ---------------------------------------------------------------------------
def prepare_params(params, input_dim):
    dims = [input_dim] + [w.shape[0] for (w, _) in params]
    dims_pad = [_round_up(d, LANE) for d in dims]
    prepped = []
    for i, (w, b) in enumerate(params):
        in_d, out_d = dims[i], dims[i + 1]
        in_p, out_p = dims_pad[i], dims_pad[i + 1]
        wt = jnp.asarray(w, jnp.float32).T                      # (in, out)
        wt = jnp.pad(wt, ((0, in_p - in_d), (0, out_p - out_d)))
        bp = jnp.pad(jnp.asarray(b, jnp.float32), (0, out_p - out_d))
        prepped.append((wt.astype(jnp.bfloat16), bp[None, :]))  # bf16 W, f32 b
    return prepped, dims_pad


# ---------------------------------------------------------------------------
# Wrapper: pad, grid over batch, call the kernel, slice back
# ---------------------------------------------------------------------------
def mlp_forward_pallas(x, params, *, flatten_first=False, last_activation=False,
                       prepared=None, block_rows=None):
    N = x.shape[0]
    if flatten_first:
        x = x.reshape(N, -1)
    input_dim = x.shape[1]

    if prepared is None:
        prepared = prepare_params(params, input_dim)
    prepped, dims_pad = prepared

    num_layers = len(prepped)
    d_pad = dims_pad[0]
    out_pad = dims_pad[-1]
    out_dim = params[-1][0].shape[0]

    # Batch tile: multiple of 8 sublanes, sized so the double-buffered x/out
    # tiles stay within ~8 MiB -> comfortably inside 32 MiB scoped VMEM on
    # every chip (v7x included), leaving room for resident weights.
    if block_rows is None:
        budget = 8 * 1024 * 1024
        per_row = 2 * (d_pad * 2 + out_pad * 4)   # 2 buffers: bf16 in, f32 out
        block_rows = max(SUBLANE,
                         min(1024, (budget // per_row) // SUBLANE * SUBLANE))
    tm = min(block_rows, _round_up(N, SUBLANE))
    n_pad = _round_up(N, tm)

    # Pad input to (n_pad, d_pad); padded rows are sliced away, padded feature
    # columns hit zero-padded weight rows so they contribute nothing.
    x_p = jnp.pad(x.astype(jnp.bfloat16),
                  ((0, n_pad - N), (0, d_pad - input_dim)))

    flat = [x_p]
    in_specs = [pl.BlockSpec((tm, d_pad), lambda i: (i, 0))]
    for (wt, bp) in prepped:
        flat += [wt, bp]
        in_specs.append(pl.BlockSpec(wt.shape, lambda i: (0, 0)))   # resident
        in_specs.append(pl.BlockSpec(bp.shape, lambda i: (0, 0)))   # resident
    out_specs = pl.BlockSpec((tm, out_pad), lambda i: (i, 0))

    # TODO(synk): for very large flattened input_dim, add a trailing
    # "arbitrary" K grid axis with a VMEM f32 accumulator for the first matmul.

    flops = 2 * n_pad * sum(dims_pad[i] * dims_pad[i + 1]
                            for i in range(num_layers))
    bytes_accessed = (x_p.size * 2
                      + sum(wt.size * 2 + bp.size * 4 for (wt, bp) in prepped)
                      + n_pad * out_pad * 4)

    out = pl.pallas_call(
        _make_mlp_kernel(num_layers, last_activation=last_activation),
        out_shape=jax.ShapeDtypeStruct((n_pad, out_pad), jnp.float32),
        grid=(n_pad // tm,),
        in_specs=in_specs,
        out_specs=out_specs,
        compiler_params=pltpu.CompilerParams(
            dimension_semantics=("parallel",),
            vmem_limit_bytes=32 * 1024 * 1024,
        ),
        cost_estimate=pl.CostEstimate(flops=flops, transcendentals=0,
                                      bytes_accessed=bytes_accessed),
    )(*flat)

    return out[:N, :out_dim]


# ---------------------------------------------------------------------------
# Deterministic parameter init (mirrors nn.Linear default U(-k, k), k=1/sqrt(fan_in))
# ---------------------------------------------------------------------------
def init_simple_mlp_params(key, input_dim, hidden_dims, num_classes):
    dims = [input_dim] + list(hidden_dims) + [num_classes]
    params = []
    for i in range(len(dims) - 1):
        fan_in, fan_out = dims[i], dims[i + 1]
        key, kw, kb = jax.random.split(key, 3)
        bound = 1.0 / jnp.sqrt(fan_in)
        w = jax.random.uniform(kw, (fan_out, fan_in), jnp.float32, -bound, bound)
        b = jax.random.uniform(kb, (fan_out,), jnp.float32, -bound, bound)
        params.append((w, b))
    return params


# ---------------------------------------------------------------------------
# Pure-JAX references
# ---------------------------------------------------------------------------
def mlp_forward_ref(x, params, *, flatten_first=False, last_activation=False,
                    emulate_bf16=False):
    N = x.shape[0]
    out = x.reshape(N, -1) if flatten_first else x
    out = out.astype(jnp.float32)
    for i, (w, b) in enumerate(params):
        wt = w.T.astype(jnp.float32)
        if emulate_bf16:
            out = jnp.dot(out.astype(jnp.bfloat16), wt.astype(jnp.bfloat16),
                          preferred_element_type=jnp.float32) + b
        else:
            out = out @ wt + b
        is_last = i == len(params) - 1
        if (not is_last) or last_activation:
            out = jnp.maximum(out, 0.0)
    return out


if __name__ == "__main__":
    # SimpleMLP(input_dim=4*16*16, hidden_dims=[32, 32], num_classes=10,
    #           flatten_first=True, last_activation=False)
    key = jax.random.PRNGKey(0)
    kx, kp = jax.random.split(key)

    batch, C, H, W = 2, 4, 16, 16
    input_dim = C * H * W
    hidden_dims = [32, 32]
    num_classes = 10

    x = jax.random.normal(kx, (batch, C, H, W), jnp.float32)
    params = init_simple_mlp_params(kp, input_dim, hidden_dims, num_classes)

    # Prepare (transpose/pad/cast) weights once, reuse across calls.
    prepared = prepare_params(params, input_dim)

    out = mlp_forward_pallas(x, params, flatten_first=True,
                             last_activation=False, prepared=prepared)
    out = jax.block_until_ready(out)

    ref_bf16 = mlp_forward_ref(x, params, flatten_first=True,
                               last_activation=False, emulate_bf16=True)
    ref_f32 = mlp_forward_ref(x, params, flatten_first=True,
                              last_activation=False, emulate_bf16=False)

    assert out.shape == (batch, num_classes), out.shape
    assert jnp.allclose(out, ref_bf16, atol=1e-2, rtol=1e-2), \
        "mismatch vs bf16-matmul reference"
    assert jnp.allclose(out, ref_f32, atol=5e-2, rtol=5e-2), \
        "mismatch vs f32 reference"

    print("KERNEL_OK")
</pallas_src>

<mosaic_0001>
module attributes {stable_mosaic.version = 11 : i64} {
  func.func @kernel(%arg0: i32, %arg1: memref<8x1024xbf16, #tpu.memory_space<vmem>>, %arg2: memref<1024x128xbf16, #tpu.memory_space<vmem>>, %arg3: memref<1x128xf32, #tpu.memory_space<vmem>>, %arg4: memref<128x128xbf16, #tpu.memory_space<vmem>>, %arg5: memref<1x128xf32, #tpu.memory_space<vmem>>, %arg6: memref<128x128xbf16, #tpu.memory_space<vmem>>, %arg7: memref<1x128xf32, #tpu.memory_space<vmem>>, %arg8: memref<8x128xf32, #tpu.memory_space<vmem>>) attributes {dimension_semantics = [#tpu.dimension_semantics<parallel>], iteration_bounds = array<i64: 1>, scalar_prefetch = 0 : i64, scratch_operands = 0 : i64, tpu.core_type = #tpu.core_type<tc>, window_params = [{transform_indices = @transform_0, window_bounds = array<i64: 8, 1024>}, {pipeline_mode = #tpu.pipeline_mode<synchronous>, transform_indices = @transform_1, window_bounds = array<i64: 1024, 128>}, {pipeline_mode = #tpu.pipeline_mode<synchronous>, transform_indices = @transform_2, window_bounds = array<i64: 1, 128>}, {pipeline_mode = #tpu.pipeline_mode<synchronous>, transform_indices = @transform_3, window_bounds = array<i64: 128, 128>}, {pipeline_mode = #tpu.pipeline_mode<synchronous>, transform_indices = @transform_4, window_bounds = array<i64: 1, 128>}, {pipeline_mode = #tpu.pipeline_mode<synchronous>, transform_indices = @transform_5, window_bounds = array<i64: 128, 128>}, {pipeline_mode = #tpu.pipeline_mode<synchronous>, transform_indices = @transform_6, window_bounds = array<i64: 1, 128>}, {transform_indices = @transform_7, window_bounds = array<i64: 8, 128>}]} {
    %c0 = arith.constant 0 : index
    %c0_0 = arith.constant 0 : index
    %0 = vector.load %arg1[%c0, %c0_0] : memref<8x1024xbf16, #tpu.memory_space<vmem>>, vector<8x1024xbf16>
    %c0_1 = arith.constant 0 : index
    %c0_2 = arith.constant 0 : index
    %1 = vector.load %arg2[%c0_1, %c0_2] : memref<1024x128xbf16, #tpu.memory_space<vmem>>, vector<1024x128xbf16>
    %c0_3 = arith.constant 0 : index
    %c0_4 = arith.constant 0 : index
    %2 = vector.load %arg3[%c0_3, %c0_4] : memref<1x128xf32, #tpu.memory_space<vmem>>, vector<1x128xf32>
    %cst = arith.constant dense<0.000000e+00> : vector<8x128xf32>
    %3 = tpu.matmul %0, %1, %cst {dimension_numbers = #tpu.dot_dimension_numbers<[1], [0], [0], [1], [0, 0, 1, 1], [], []>} : vector<8x1024xbf16>, vector<1024x128xbf16>, vector<8x128xf32> -> vector<8x128xf32>
    %4 = vector.broadcast %2 : vector<1x128xf32> to vector<8x128xf32>
    %5 = arith.addf %3, %4 : vector<8x128xf32>
    %cst_5 = arith.constant 0.000000e+00 : f32
    %6 = vector.broadcast %cst_5 : f32 to vector<8x128xf32>
    %7 = arith.maximumf %5, %6 : vector<8x128xf32>
    %8 = arith.truncf %7 : vector<8x128xf32> to vector<8x128xbf16>
    %c0_6 = arith.constant 0 : index
    %c0_7 = arith.constant 0 : index
    %9 = vector.load %arg4[%c0_6, %c0_7] : memref<128x128xbf16, #tpu.memory_space<vmem>>, vector<128x128xbf16>
    %c0_8 = arith.constant 0 : index
    %c0_9 = arith.constant 0 : index
    %10 = vector.load %arg5[%c0_8, %c0_9] : memref<1x128xf32, #tpu.memory_space<vmem>>, vector<1x128xf32>
    %cst_10 = arith.constant dense<0.000000e+00> : vector<8x128xf32>
    %11 = tpu.matmul %8, %9, %cst_10 {dimension_numbers = #tpu.dot_dimension_numbers<[1], [0], [0], [1], [0, 0, 1, 1], [], []>} : vector<8x128xbf16>, vector<128x128xbf16>, vector<8x128xf32> -> vector<8x128xf32>
    %12 = vector.broadcast %10 : vector<1x128xf32> to vector<8x128xf32>
    %13 = arith.addf %11, %12 : vector<8x128xf32>
    %cst_11 = arith.constant 0.000000e+00 : f32
    %14 = vector.broadcast %cst_11 : f32 to vector<8x128xf32>
    %15 = arith.maximumf %13, %14 : vector<8x128xf32>
    %16 = arith.truncf %15 : vector<8x128xf32> to vector<8x128xbf16>
    %c0_12 = arith.constant 0 : index
    %c0_13 = arith.constant 0 : index
    %17 = vector.load %arg6[%c0_12, %c0_13] : memref<128x128xbf16, #tpu.memory_space<vmem>>, vector<128x128xbf16>
    %c0_14 = arith.constant 0 : index
    %c0_15 = arith.constant 0 : index
    %18 = vector.load %arg7[%c0_14, %c0_15] : memref<1x128xf32, #tpu.memory_space<vmem>>, vector<1x128xf32>
    %cst_16 = arith.constant dense<0.000000e+00> : vector<8x128xf32>
    %19 = tpu.matmul %16, %17, %cst_16 {dimension_numbers = #tpu.dot_dimension_numbers<[1], [0], [0], [1], [0, 0, 1, 1], [], []>} : vector<8x128xbf16>, vector<128x128xbf16>, vector<8x128xf32> -> vector<8x128xf32>
    %20 = vector.broadcast %18 : vector<1x128xf32> to vector<8x128xf32>
    %21 = arith.addf %19, %20 : vector<8x128xf32>
    %c0_17 = arith.constant 0 : index
    %c0_18 = arith.constant 0 : index
    %22 = vector.load %arg8[%c0_17, %c0_18] : memref<8x128xf32, #tpu.memory_space<vmem>>, vector<8x128xf32>
    tpu.vector_store %arg8[%c0_17, %c0_18], %21 {strides = array<i32>} : memref<8x128xf32, #tpu.memory_space<vmem>>, vector<8x128xf32>,
    return
  }
  func.func @transform_0(%arg0: i32) -> (i32, i32) {
    %c0_i32 = arith.constant 0 : i32
    %c0_i32_0 = arith.constant 0 : i32
    return %arg0, %c0_i32 : i32, i32
  }
  func.func @transform_1(%arg0: i32) -> (i32, i32) {
    %c0_i32 = arith.constant 0 : i32
    %c0_i32_0 = arith.constant 0 : i32
    %c0_i32_1 = arith.constant 0 : i32
    return %c0_i32, %c0_i32_0 : i32, i32
  }
  func.func @transform_2(%arg0: i32) -> (i32, i32) {
    %c0_i32 = arith.constant 0 : i32
    %c0_i32_0 = arith.constant 0 : i32
    %c0_i32_1 = arith.constant 0 : i32
    return %c0_i32, %c0_i32_0 : i32, i32
  }
  func.func @transform_3(%arg0: i32) -> (i32, i32) {
    %c0_i32 = arith.constant 0 : i32
    %c0_i32_0 = arith.constant 0 : i32
    %c0_i32_1 = arith.constant 0 : i32
    return %c0_i32, %c0_i32_0 : i32, i32
  }
  func.func @transform_4(%arg0: i32) -> (i32, i32) {
    %c0_i32 = arith.constant 0 : i32
    %c0_i32_0 = arith.constant 0 : i32
    %c0_i32_1 = arith.constant 0 : i32
    return %c0_i32, %c0_i32_0 : i32, i32
  }
  func.func @transform_5(%arg0: i32) -> (i32, i32) {
    %c0_i32 = arith.constant 0 : i32
    %c0_i32_0 = arith.constant 0 : i32
    %c0_i32_1 = arith.constant 0 : i32
    return %c0_i32, %c0_i32_0 : i32, i32
  }
  func.func @transform_6(%arg0: i32) -> (i32, i32) {
    %c0_i32 = arith.constant 0 : i32
    %c0_i32_0 = arith.constant 0 : i32
    %c0_i32_1 = arith.constant 0 : i32
    return %c0_i32, %c0_i32_0 : i32, i32
  }
  func.func @transform_7(%arg0: i32) -> (i32, i32) {
    %c0_i32 = arith.constant 0 : i32
    %c0_i32_0 = arith.constant 0 : i32
    return %arg0, %c0_i32 : i32, i32
  }
}

</mosaic_0001>

<bundles_post_ra>
// kernel: tpu_custom_call.1
= control target key start
LH: loop header
LB: loop body
LE: loop exit
PB: predicated region body
PF: predicated region fallthrough
CT: control target
= control target key end

     0   :  { %12 = vsyncpa [#allocation3], 0  ;;  %s1535_s0 = inlined_call_operand.hbm [shape: bf16[8,1024], index: 0, kind: input, shape index: {}]   ;;  %s1536_s1 = inlined_call_operand.hbm [shape: bf16[1024,128], index: 1, kind: input, shape index: {}]   ;;  %s1537_s2 = inlined_call_operand.vmem [shape: f32[1,128], index: 2, kind: input, shape index: {}]   ;;  %s1538_s3 = inlined_call_operand.hbm [shape: bf16[128,128], index: 3, kind: input, shape index: {}]   ;;  %s1539_s4 = inlined_call_operand.vmem [shape: f32[1,128], index: 4, kind: input, shape index: {}]   ;;  %s1540_s5 = inlined_call_operand.hbm [shape: bf16[128,128], index: 5, kind: input, shape index: {}]   ;;  %s1541_s6 = inlined_call_operand.vmem [shape: f32[1,128], index: 6, kind: input, shape index: {}]   ;;  %s1542_s7 = inlined_call_operand.hbm [shape: f32[8,128], index: 7, kind: output, shape index: {}]  }
   0x1   :  { %13 = vsyncpa [#allocation6], 0 }
   0x2   :  { %14 = vsyncpa [#allocation9], 0  ;;  %s31_s26 = sshll.u32 %s1536_s1, 4  ;;  %s32_s26 = int_to_ptr.hbm [resolvable:$true] %s31_s26 }
   0x3   :  { %15 = vsyncpa [#allocation4], 0  ;;  %s1464_s27 = smov [#allocation5]   ;;  %s21_s8 = sshll.u32 %s1535_s0, 4  ;;  %s22_s8 = int_to_ptr.hbm [resolvable:$true] %s21_s8 }
   0x4   :  { %s33_s28 = sshll.u32 %s1464_s27, 4  ;;  %s1465_s9 = smov 64   ;;  %s34_s28 = int_to_ptr.vmem [resolvable:$true] %s33_s28 }
   0x5   :  { %s1466_s10 = smov 4   ;;  %s1467_s11 = smov [#allocation2]  }
   0x6   :  { %39 = dma.hbm_to_vmem [thread:$0]  %s32_s26, 8192, %s34_s28, [#allocation6], %s1465_s9, %s1465_s9, %s1466_s10  }
   0x7   :  { %s23_s12 = sshll.u32 %s1467_s11, 4  ;;  %s46_s15 = sshll.u32 %s1538_s3, 4  ;;  %s24_s12 = int_to_ptr.vmem [resolvable:$true] %s23_s12  ;;  %s47_s15 = int_to_ptr.hbm [resolvable:$true] %s46_s15 }
   0x8   :  { %26 = dma.hbm_to_vmem [thread:$0]  %s22_s8, 512, %s24_s12, [#allocation3]  }
   0x9   :  { %s61_s17 = sshll.u32 %s1540_s5, 4  ;;  %s1468_s18 = smov [#allocation7]   ;;  %s62_s17 = int_to_ptr.hbm [resolvable:$true] %s61_s17 }
   0xa   :  { %s48_s19 = sshll.u32 %s1468_s18, 4  ;;  %s1469_s0 = smov [#allocation8]   ;;  %s49_s19 = int_to_ptr.vmem [resolvable:$true] %s48_s19 }
   0xb   :  { %54 = dma.hbm_to_vmem [thread:$0]  %s47_s15, 1024, %s49_s19, [#allocation6], %s1465_s9, %s1465_s9, %s1466_s10  }
   0xc   :  { %s63_s20 = sshll.u32 %s1469_s0, 4  ;;  %s64_s20 = int_to_ptr.vmem [resolvable:$true] %s63_s20 }
   0xd   :  { %69 = dma.hbm_to_vmem [thread:$0]  %s62_s17, 1024, %s64_s20, [#allocation9], %s1465_s9, %s1465_s9, %s1466_s10  }
   0xe   :  { %1456 = dma.done.wait [#allocation3], 512  }
   0xf   :  { %1457 = vsyncadd [#allocation3], 4294966784 }
  0x10   :  { %1458 = dma.done.wait [#allocation6], 9216  }
  0x11   :  { %1459 = vsyncadd [#allocation6], 4294958080 }
  0x12   :  { %1460 = dma.done.wait [#allocation9], 1024  }
  0x13   :  { %1461 = vsyncadd [#allocation9], 4294966272  ;;  %v1253_v0 = vld [vmem:[#allocation5 + $0x38] sm:$0xff]  ;;  %v1252_v4 = vld [vmem:[#allocation5 + $0x30] sm:$0xff]  ;;  %s1470_s24 = smov [#allocation10]   ;;  %s914_s28 = sshll.u32 %s1542_s7, 4  ;;  %s915_s28 = int_to_ptr.hbm [resolvable:$true] %s914_s28 }
  0x14   :  { %v1261_v1 = vld [vmem:[#allocation5 + $0x78] sm:$0xff]  ;;  %636 = vmatpush.bf16.msra.mxu0 %v1253_v0  ;;  %v1260_v5 = vld [vmem:[#allocation5 + $0x70] sm:$0xff]  ;;  %v1251_v8 = vld [vmem:[#allocation5 + $0x28] sm:$0xff]  ;;  %s912_s25 = sshll.u32 %s1470_s24, 4  ;;  %s913_s25 = int_to_ptr.vmem [resolvable:$true] %s912_s25 }
  0x15   :  { %v1269_v2 = vld [vmem:[#allocation5 + $0xb8] sm:$0xff]  ;;  %649 = vmatpush.bf16.msra.mxu1 %v1261_v1  ;;  %v1268_v6 = vld [vmem:[#allocation5 + $0xb0] sm:$0xff]  ;;  %v1259_v9 = vld [vmem:[#allocation5 + $0x68] sm:$0xff] }
  0x16   :  { %v1277_v3 = vld [vmem:[#allocation5 + $0xf8] sm:$0xff]  ;;  %662 = vmatpush.bf16.msra.mxu2 %v1269_v2  ;;  %v1276_v7 = vld [vmem:[#allocation5 + $0xf0] sm:$0xff]  ;;  %v1267_v10 = vld [vmem:[#allocation5 + $0xa8] sm:$0xff] }
  0x17   :  { %675 = vmatpush.bf16.msra.mxu3 %v1277_v3  ;;  %v1275_v11 = vld [vmem:[#allocation5 + $0xe8] sm:$0xff]  ;;  %v1250_v12 = vld [vmem:[#allocation5 + $0x20] sm:$0xff]  ;;  %v1249_v16 = vld [vmem:[#allocation5 + $0x18] sm:$0xff] }
  0x18   :  { %637 = vmatpush.bf16.msra.mxu0 %v1252_v4  ;;  %v1258_v13 = vld [vmem:[#allocation5 + $0x60] sm:$0xff]  ;;  %v1257_v17 = vld [vmem:[#allocation5 + $0x58] sm:$0xff]  ;;  %v1248_v20 = vld [vmem:[#allocation5 + $0x10] sm:$0xff] }
  0x19   :  { %650 = vmatpush.bf16.msra.mxu1 %v1260_v5  ;;  %v1266_v14 = vld [vmem:[#allocation5 + $0xa0] sm:$0xff]  ;;  %v1265_v18 = vld [vmem:[#allocation5 + $0x98] sm:$0xff]  ;;  %v1256_v21 = vld [vmem:[#allocation5 + $0x50] sm:$0xff] }
  0x1a   :  { %663 = vmatpush.bf16.msra.mxu2 %v1268_v6  ;;  %v1274_v15 = vld [vmem:[#allocation5 + $0xe0] sm:$0xff]  ;;  %v1273_v19 = vld [vmem:[#allocation5 + $0xd8] sm:$0xff]  ;;  %v1264_v22 = vld [vmem:[#allocation5 + $0x90] sm:$0xff] }
  0x1b   :  { %676 = vmatpush.bf16.msra.mxu3 %v1276_v7  ;;  %v1272_v23 = vld [vmem:[#allocation5 + $0xd0] sm:$0xff]  ;;  %v1247_v24 = vld [vmem:[#allocation5 + $0x8] sm:$0xff]  ;;  %v88_v29 = vld [vmem:[#allocation2] sm:$0xff] }
  0x1c   :  { %638 = vmatpush.bf16.msra.mxu0 %v1251_v8  ;;  %v1255_v25 = vld [vmem:[#allocation5 + $0x48] sm:$0xff]  ;;  %v1246_v30 = vld [vmem:[#allocation5] sm:$0xff]  ;;  %v228_v33 = vunpack.c.l.b16 %v88_v29  ;;  %v229_v37 = vunpack.c.h.b16 %v88_v29  ;;  %v1285_v38 = vld [vmem:[#allocation5 + $0x138] sm:$0xff] }
  0x1d   :  { %651 = vmatpush.bf16.msra.mxu1 %v1259_v9  ;;  %v1263_v26 = vld [vmem:[#allocation5 + $0x88] sm:$0xff]  ;;  %v1254_v31 = vld [vmem:[#allocation5 + $0x40] sm:$0xff]  ;;  %v1293_v39 = vld [vmem:[#allocation5 + $0x178] sm:$0xff] }
  0x1e   :  { %664 = vmatpush.bf16.msra.mxu2 %v1267_v10  ;;  %v1271_v27 = vld [vmem:[#allocation5 + $0xc8] sm:$0xff]  ;;  %v1262_v34 = vld [vmem:[#allocation5 + $0x80] sm:$0xff]  ;;  %v1301_v40 = vld [vmem:[#allocation5 + $0x1b8] sm:$0xff]  ;;  %v236_v43 = vpack.c.b16 %v228_v33, %v228_v33  ;;  %v237_v45 = vpack.c.b16 %v229_v37, %v229_v37 }
  0x1f   :  { %677 = vmatpush.bf16.msra.mxu3 %v1275_v11  ;;  %v89_v28 = vld [vmem:[#allocation2 + $0x8] sm:$0xff]  ;;  %v1270_v35 = vld [vmem:[#allocation5 + $0xc0] sm:$0xff]  ;;  %v1309_v41 = vld [vmem:[#allocation5 + $0x1f8] sm:$0xff] }
  0x20   :  { %639 = vmatpush.bf16.msra.mxu0 %v1250_v12  ;;  %v230_v32 = vunpack.c.l.b16 %v89_v28  ;;  %v231_v36 = vunpack.c.h.b16 %v89_v28  ;;  %v1284_v46 = vld [vmem:[#allocation5 + $0x130] sm:$0xff]  ;;  %v1283_v50 = vld [vmem:[#allocation5 + $0x128] sm:$0xff]  ;;  %v1282_v54 = vld [vmem:[#allocation5 + $0x120] sm:$0xff] }
  0x21   :  { %652 = vmatpush.bf16.msra.mxu1 %v1258_v13  ;;  %v1292_v47 = vld [vmem:[#allocation5 + $0x170] sm:$0xff]  ;;  %v1291_v51 = vld [vmem:[#allocation5 + $0x168] sm:$0xff]  ;;  %v1290_v55 = vld [vmem:[#allocation5 + $0x160] sm:$0xff] }
  0x22   :  { %665 = vmatpush.bf16.msra.mxu2 %v1266_v14  ;;  %v238_v42 = vpack.c.b16 %v230_v32, %v230_v32  ;;  %v239_v44 = vpack.c.b16 %v231_v36, %v231_v36  ;;  %v1300_v48 = vld [vmem:[#allocation5 + $0x1b0] sm:$0xff]  ;;  %v1299_v52 = vld [vmem:[#allocation5 + $0x1a8] sm:$0xff]  ;;  %v1298_v56 = vld [vmem:[#allocation5 + $0x1a0] sm:$0xff] }
  0x23   :  { %678 = vmatpush.bf16.msra.mxu3 %v1274_v15  ;;  %v1308_v49 = vld [vmem:[#allocation5 + $0x1f0] sm:$0xff]  ;;  %v1307_v53 = vld [vmem:[#allocation5 + $0x1e8] sm:$0xff]  ;;  %v1306_v57 = vld [vmem:[#allocation5 + $0x1e0] sm:$0xff] }
  0x24   :  { %640 = vmatpush.bf16.msra.mxu0 %v1249_v16  ;;  %v1281_v58 = vld [vmem:[#allocation5 + $0x118] sm:$0xff]  ;;  %v1280_v62 = vld [vmem:[#allocation5 + $0x110] sm:$0xff]  ;;  %v1279_v2 = vld [vmem:[#allocation5 + $0x108] sm:$0xff] }
  0x25   :  { %653 = vmatpush.bf16.msra.mxu1 %v1257_v17  ;;  %v1289_v59 = vld [vmem:[#allocation5 + $0x158] sm:$0xff]  ;;  %v1288_v63 = vld [vmem:[#allocation5 + $0x150] sm:$0xff]  ;;  %v1287_v3 = vld [vmem:[#allocation5 + $0x148] sm:$0xff] }
  0x26   :  { %666 = vmatpush.bf16.msra.mxu2 %v1265_v18  ;;  %v1297_v60 = vld [vmem:[#allocation5 + $0x198] sm:$0xff]  ;;  %v1296_v0 = vld [vmem:[#allocation5 + $0x190] sm:$0xff]  ;;  %v1295_v5 = vld [vmem:[#allocation5 + $0x188] sm:$0xff] }
  0x27   :  { %679 = vmatpush.bf16.msra.mxu3 %v1273_v19  ;;  %v1305_v61 = vld [vmem:[#allocation5 + $0x1d8] sm:$0xff]  ;;  %v1304_v1 = vld [vmem:[#allocation5 + $0x1d0] sm:$0xff]  ;;  %v1303_v6 = vld [vmem:[#allocation5 + $0x1c8] sm:$0xff] }
  0x28   :  { %641 = vmatpush.bf16.msra.mxu0 %v1248_v20  ;;  %v90_v4 = vld [vmem:[#allocation2 + $0x10] sm:$0xff]  ;;  %v91_v7 = vld [vmem:[#allocation2 + $0x18] sm:$0xff]  ;;  %v1278_v10 = vld [vmem:[#allocation5 + $0x100] sm:$0xff] }
  0x29   :  { %654 = vmatpush.bf16.msra.mxu1 %v1256_v21  ;;  %v232_v8 = vunpack.c.l.b16 %v90_v4  ;;  %v233_v9 = vunpack.c.h.b16 %v90_v4  ;;  %v1286_v11 = vld [vmem:[#allocation5 + $0x140] sm:$0xff]  ;;  %v234_v12 = vunpack.c.l.b16 %v91_v7  ;;  %v235_v13 = vunpack.c.h.b16 %v91_v7  ;;  %v1317_v20 = vld [vmem:[#allocation7 + $0x38] sm:$0xff]  ;;  %v1316_v21 = vld [vmem:[#allocation7 + $0x30] sm:$0xff] }
  0x2a   :  { %667 = vmatpush.bf16.msra.mxu2 %v1264_v22  ;;  %v1294_v14 = vld [vmem:[#allocation5 + $0x180] sm:$0xff]  ;;  %v1315_v22 = vld [vmem:[#allocation7 + $0x28] sm:$0xff] }
  0x2b   :  { %680 = vmatpush.bf16.msra.mxu3 %v1272_v23  ;;  %v1302_v15 = vld [vmem:[#allocation5 + $0x1c0] sm:$0xff]  ;;  %v240_v16 = vpack.c.b16 %v232_v8, %v232_v8  ;;  %v241_v17 = vpack.c.b16 %v233_v9, %v233_v9  ;;  %v242_v18 = vpack.c.b16 %v234_v12, %v234_v12  ;;  %v243_v19 = vpack.c.b16 %v235_v13, %v235_v13  ;;  %v1311_v28 = vld [vmem:[#allocation7 + $0x8] sm:$0xff] }
  0x2c   :  { %642 = vmatpush.bf16.msra.mxu0 %v1247_v24  ;;  %v1314_v23 = vld [vmem:[#allocation7 + $0x20] sm:$0xff]  ;;  %v1313_v24 = vld [vmem:[#allocation7 + $0x18] sm:$0xff] }
  0x2d   :  { %655 = vmatpush.bf16.msra.mxu1 %v1255_v25  ;;  %v1310_v32 = vld [vmem:[#allocation7] sm:$0xff] }
  0x2e   :  { %668 = vmatpush.bf16.msra.mxu2 %v1263_v26  ;;  %v1312_v26 = vld [vmem:[#allocation7 + $0x10] sm:$0xff] }
  0x2f   :  { %681 = vmatpush.bf16.msra.mxu3 %v1271_v27 }
  0x30   :  { %643 = vmatpush.bf16.msra.mxu0 %v1246_v30 }
  0x31   :  { %656 = vmatpush.bf16.msra.mxu1 %v1254_v31 }
  0x32   :  { %669 = vmatpush.bf16.msra.mxu2 %v1262_v34  ;;  %v1333_v34 = vld [vmem:[%s1537_s2] ss:$0 sm:$0xff] }
  0x33   :  { %682 = vmatpush.bf16.msra.mxu3 %v1270_v35  ;;  %644 = vmatmul.bf16.vlgmr.msra.gmra.mxu0 %v236_v43  ;;  %v1325_v35 = vld [vmem:[#allocation8 + $0x38] sm:$0xff] }
  0x34   :  { %688 = vmatpush.bf16.msrb.mxu0 %v1285_v38  ;;  %657 = vmatmul.bf16.vlgmr.msra.gmra.mxu1 %v237_v45  ;;  %v1324_v38 = vld [vmem:[#allocation8 + $0x30] sm:$0xff] }
  0x35   :  { %701 = vmatpush.bf16.msrb.mxu1 %v1293_v39  ;;  %670 = vmatmul.bf16.vlgmr.msra.gmra.mxu2 %v238_v42  ;;  %v1322_v42 = vld [vmem:[#allocation8 + $0x20] sm:$0xff] }
  0x36   :  { %714 = vmatpush.bf16.msrb.mxu2 %v1301_v40  ;;  %683 = vmatmul.bf16.vlgmr.msra.gmra.mxu3 %v239_v44  ;;  %v1323_v40 = vld [vmem:[#allocation8 + $0x28] sm:$0xff]  ;;  %v1321_v44 = vld [vmem:[#allocation8 + $0x18] sm:$0xff] }
  0x37   :  { %727 = vmatpush.bf16.msrb.mxu3 %v1309_v41 }
  0x38   :  { %689 = vmatpush.bf16.msrb.mxu0 %v1284_v46 }
  0x39   :  { %702 = vmatpush.bf16.msrb.mxu1 %v1292_v47 }
  0x3a   :  { %715 = vmatpush.bf16.msrb.mxu2 %v1300_v48 }
  0x3b   :  { %728 = vmatpush.bf16.msrb.mxu3 %v1308_v49  ;;  %v1320_v49 = vld [vmem:[#allocation8 + $0x10] sm:$0xff] }
  0x3c   :  { %690 = vmatpush.bf16.msrb.mxu0 %v1283_v50 }
  0x3d   :  { %703 = vmatpush.bf16.msrb.mxu1 %v1291_v51 }
  0x3e   :  { %716 = vmatpush.bf16.msrb.mxu2 %v1299_v52 }
  0x3f   :  { %729 = vmatpush.bf16.msrb.mxu3 %v1307_v53 }
  0x40   :  { %691 = vmatpush.bf16.msrb.mxu0 %v1282_v54 }
  0x41   :  { %704 = vmatpush.bf16.msrb.mxu1 %v1290_v55 }
  0x42   :  { %717 = vmatpush.bf16.msrb.mxu2 %v1298_v56 }
  0x43   :  { %730 = vmatpush.bf16.msrb.mxu3 %v1306_v57 }
  0x44   :  { %692 = vmatpush.bf16.msrb.mxu0 %v1281_v58 }
  0x45   :  { %705 = vmatpush.bf16.msrb.mxu1 %v1289_v59 }
  0x46   :  { %718 = vmatpush.bf16.msrb.mxu2 %v1297_v60 }
  0x47   :  { %731 = vmatpush.bf16.msrb.mxu3 %v1305_v61  ;;  %v1319_v61 = vld [vmem:[#allocation8 + $0x8] sm:$0xff] }
  0x48   :  { %693 = vmatpush.bf16.msrb.mxu0 %v1280_v62  ;;  %v1318_v62 = vld [vmem:[#allocation8] sm:$0xff] }
  0x49   :  { %706 = vmatpush.bf16.msrb.mxu1 %v1288_v63  ;;  %v1334_v63 = vld [vmem:[%s1539_s4] ss:$0 sm:$0xff] }
  0x4a   :  { %719 = vmatpush.bf16.msrb.mxu2 %v1296_v0 }
  0x4b   :  { %732 = vmatpush.bf16.msrb.mxu3 %v1304_v1 }
  0x4c   :  { %694 = vmatpush.bf16.msrb.mxu0 %v1279_v2 }
  0x4d   :  { %707 = vmatpush.bf16.msrb.mxu1 %v1287_v3 }
  0x4e   :  { %720 = vmatpush.bf16.msrb.mxu2 %v1295_v5  ;;  %v1335_v5 = vld [vmem:[%s1541_s6] ss:$0 sm:$0xff] }
  0x4f   :  { %733 = vmatpush.bf16.msrb.mxu3 %v1303_v6 }
  0x50   :  { %695 = vmatpush.bf16.msrb.mxu0 %v1278_v10 }
  0x51   :  { %708 = vmatpush.bf16.msrb.mxu1 %v1286_v11 }
  0x52   :  { %721 = vmatpush.bf16.msrb.mxu2 %v1294_v14 }
  0x53   :  { %734 = vmatpush.bf16.msrb.mxu3 %v1302_v15  ;;  %696 = vmatmul.bf16.vlgmr.msrb.gmra.mxu0 %v240_v16 }
  0x54   :  { %709 = vmatmul.bf16.vlgmr.msrb.gmra.mxu1 %v241_v17  ;;  %810 = vmatpush.bf16.msra.mxu0 %v1317_v20 }
  0x55   :  { %722 = vmatmul.bf16.vlgmr.msrb.gmra.mxu2 %v242_v18  ;;  %893 = vmatpush.bf16.msra.mxu1 %v1325_v35 }
  0x56   :  { %735 = vmatmul.bf16.vlgmr.msrb.gmra.mxu3 %v243_v19 }
  0x58   :  { %811 = vmatpush.bf16.msra.mxu0 %v1316_v21 }
  0x59   :  { %894 = vmatpush.bf16.msra.mxu1 %v1324_v38 }
  0x5c   :  { %812 = vmatpush.bf16.msra.mxu0 %v1315_v22 }
  0x5d   :  { %895 = vmatpush.bf16.msra.mxu1 %v1323_v40 }
  0x60   :  { %813 = vmatpush.bf16.msra.mxu0 %v1314_v23 }
  0x61   :  { %896 = vmatpush.bf16.msra.mxu1 %v1322_v42 }
  0x64   :  { %814 = vmatpush.bf16.msra.mxu0 %v1313_v24 }
  0x65   :  { %897 = vmatpush.bf16.msra.mxu1 %v1321_v44 }
  0x68   :  { %815 = vmatpush.bf16.msra.mxu0 %v1312_v26 }
  0x69   :  { %898 = vmatpush.bf16.msra.mxu1 %v1320_v49 }
  0x6c   :  { %816 = vmatpush.bf16.msra.mxu0 %v1311_v28 }
  0x6d   :  { %899 = vmatpush.bf16.msra.mxu1 %v1319_v61 }
  0x70   :  { %817 = vmatpush.bf16.msra.mxu0 %v1310_v32 }
  0x71   :  { %900 = vmatpush.bf16.msra.mxu1 %v1318_v62 }
  0xb0   :  { %v645_v25 = vpop.f32.mrf.mxu0 }
  0xb1   :  { %v658_v27 = vpop.f32.mrf.mxu1  ;;  %v646_v39 = vadd.f32 %v1333_v34, %v645_v25 }
  0xb3   :  { %v659_v41 = vadd.f32 %v658_v27, %v646_v39 }
  0xb8   :  { %v671_v29 = vpop.f32.mrf.mxu2  ;;  %v647_v31 = vpop.f32.mrf.mxu0 }
  0xb9   :  { %v684_v30 = vpop.f32.mrf.mxu3  ;;  %v660_v33 = vpop.f32.mrf.mxu1  ;;  %v672_v43 = vadd.f32 %v671_v29, %v659_v41 }
  0xbb   :  { %v685_v45 = vadd.f32 %v684_v30, %v672_v43 }
  0xc0   :  { %v673_v36 = vpop.f32.mrf.mxu2 }
  0xc1   :  { %v686_v37 = vpop.f32.mrf.mxu3 }
  0xd0   :  { %v697_v46 = vpop.f32.mrf.mxu0 }
  0xd1   :  { %v710_v47 = vpop.f32.mrf.mxu1  ;;  %v698_v48 = vadd.f32 %v697_v46, %v685_v45 }
  0xd3   :  { %v711_v50 = vadd.f32 %v710_v47, %v698_v48 }
  0xd8   :  { %v723_v51 = vpop.f32.mrf.mxu2  ;;  %v699_v54 = vpop.f32.mrf.mxu0 }
  0xd9   :  { %v736_v52 = vpop.f32.mrf.mxu3  ;;  %v724_v53 = vadd.f32 %v723_v51, %v711_v50  ;;  %v712_v55 = vpop.f32.mrf.mxu1 }
  0xdb   :  { %v737_v56 = vadd.f32 %v736_v52, %v724_v53 }
  0xdd   :  { %v740_v57 = vmax.f32 %v737_v56, 0.0 }
  0xdf   :  { %v741_v58 = vpack.c.bf16 %v740_v57, %v740_v57 }
  0xe0   :  { %v725_v59 = vpop.f32.mrf.mxu2 }
  0xe1   :  { %v738_v60 = vpop.f32.mrf.mxu3  ;;  %818 = vmatmul.bf16.vlgmr.msra.gmra.mxu0 %v741_v58 }
 0x15e   :  { %v819_v0 = vpop.f32.mrf.mxu0 }
 0x15f   :  { %v820_v1 = vadd.f32 %v1334_v63, %v819_v0 }
 0x161   :  { %v823_v2 = vmax.f32 %v820_v1, 0.0 }
 0x163   :  { %v824_v3 = vpack.c.bf16 %v823_v2, %v823_v2 }
 0x165   :  { %901 = vmatmul.bf16.vlgmr.msra.gmra.mxu1 %v824_v3 }
 0x166   :  { %v821_v4 = vpop.f32.mrf.mxu0 }
 0x1e2   :  { %v902_v6 = vpop.f32.mrf.mxu1 }
 0x1e3   :  { %v903_v7 = vadd.f32 %v1335_v5, %v902_v6 }
 0x1e5   :  { %906 = vst [vmem:[#allocation10] sm:$0xff] %v903_v7 }
 0x1e6   :  { %917 = dma.vmem_to_hbm [thread:$0]  %s913_s25, 128, %s915_s28, [#allocation4]  }
 0x1ea   :  { %v904_v8 = vpop.f32.mrf.mxu1 }
 0x1eb   :  { %1462 = dma.done.wait [#allocation4], 128  }
 0x1ec   :  { %1463 = vsyncadd [#allocation4], 4294967168 }
 0x1ed   :  { %922 = vsyncpa [#allocation3], 1 }
 0x1ee   :  { %923 = vsyncpa [#allocation6], 1 }
 0x1ef   :  { %924 = vsyncpa [#allocation9], 1 }
 0x1f0   :  { %925 = vsyncpa [#allocation4], 1 }

</bundles_post_ra>
